<compile_context>
chip_gen: v7x
topology: tpu7x:2x2x1
jax: 0.10.0
libtpu: 0.0.40
codegen_flags: <defaults>
</compile_context>

<pallas_src>
import math

import numpy as np
import jax
import jax.numpy as jnp
from jax.experimental import pallas as pl
from jax.experimental.pallas import tpu as pltpu

# ---------------- config (synthetic, scaled-down) ----------------
BASE_DIM = 32          # encoder/decoder hidden size
NUM_HEADS = 4
HEAD_DIM = BASE_DIM // NUM_HEADS
FFN_DIM = 64
VOCAB = 64
VOCAB_PAD = 128        # logits padded to a full 128-lane store
MAX_POS = 64
PAD_ID = 0
DECODER_START_ID = 2   # cls_token_id (adapt_tokenizer)
IMG_SIZE = (32, 32)    # config.image_size = "32,32"
NEG_INF = -1e9
LN_EPS = 1e-12
BN_EPS = 1e-5

IMAGENET_MEAN = jnp.array([0.485, 0.456, 0.406], jnp.float32)
IMAGENET_STD = jnp.array([0.229, 0.224, 0.225], jnp.float32)


# ---------------- generic row-tiled pallas_call helper ----------------
def _round_up(x, m):
    return ((x + m - 1) // m) * m


def _pad_rows(x, rows):
    m = x.shape[0]
    if rows == m:
        return x
    pad = [(0, rows - m)] + [(0, 0)] * (x.ndim - 1)
    return jnp.pad(x, pad)


def _call_tiled(kernel, out_shape, inputs, *, tiled_in, tiled_out, tile, rows,
                parallel=True):
    """Tile the leading (row) axis of selected inputs/outputs; everything else
    stays as a VMEM-resident full block (constant index_map)."""
    assert rows % tile == 0
    grid_n = rows // tile

    def _tiled_spec(shape):
        nd = len(shape)
        blk = (tile,) + tuple(shape[1:])
        return pl.BlockSpec(blk, lambda i, _nd=nd: (i,) + (0,) * (_nd - 1))

    def _full_spec(shape):
        nd = len(shape)
        return pl.BlockSpec(tuple(shape), lambda i, _nd=nd: (0,) * _nd)

    in_specs = [_tiled_spec(x.shape) if t else _full_spec(x.shape)
                for x, t in zip(inputs, tiled_in)]
    if isinstance(out_shape, (tuple, list)):
        out_shape = tuple(out_shape)
        out_specs = tuple(_tiled_spec(o.shape) if t else _full_spec(o.shape)
                          for o, t in zip(out_shape, tuple(tiled_out)))
    else:
        out_specs = (_tiled_spec(out_shape.shape) if tiled_out
                     else _full_spec(out_shape.shape))
    sem = "parallel" if (parallel and grid_n > 1) else "arbitrary"
    return pl.pallas_call(
        kernel, out_shape=out_shape, grid=(grid_n,),
        in_specs=in_specs, out_specs=out_specs,
        compiler_params=pltpu.CompilerParams(dimension_semantics=(sem,)),
    )(*inputs)


# ---------------- in-kernel building blocks ----------------
def _gelu(x):
    # TODO(synk): HF BERT heads use exact erf-GELU; tanh approximation used here.
    return jax.nn.gelu(x, approximate=True)


def _ln(x, g, b):
    mu = jnp.mean(x, axis=-1, keepdims=True)
    var = jnp.mean((x - mu) ** 2, axis=-1, keepdims=True)
    return (x - mu) * jax.lax.rsqrt(var + LN_EPS) * g + b


def _tap_mask(R, H, W, dh, dw):
    """(R,1) f32 validity mask for a 3x3 tap, built in-kernel from iota."""
    r = jax.lax.broadcasted_iota(jnp.int32, (R, 1), 0)
    i = (r // W) % H
    j = r % W
    ok = (i + dh >= 0) & (i + dh < H) & (j + dw >= 0) & (j + dw < W)
    return ok.astype(jnp.float32)


def _conv3x3(x_f32, w_ref, b_ref, H, W):
    """3x3 / stride-1 / pad-1 conv on a flattened (R, Cin) map held in VMEM.
    Row shifts via pltpu.roll (XLU) + in-kernel iota masks; 3 taps stacked on
    the contraction axis per matmul (w_ref: (3, 3*Cin, Cout) bf16, BN folded)."""
    R = x_f32.shape[0]
    acc = None
    for ti in range(3):
        dh = ti - 1
        parts = []
        for dw in (-1, 0, 1):
            s = dh * W + dw
            xs = x_f32 if s == 0 else pltpu.roll(x_f32, (-s) % R, 0)
            if not (dh == 0 and dw == 0):
                xs = xs * _tap_mask(R, H, W, dh, dw)
            parts.append(xs.astype(jnp.bfloat16))
        xcat = jnp.concatenate(parts, axis=1)                 # (R, 3*Cin) bf16
        part = jnp.dot(xcat, w_ref[ti], preferred_element_type=jnp.float32)
        acc = part if acc is None else acc + part
    return acc + b_ref[...]


def _attend(q, k, v, bias):
    """Per-head attention on already-projected q/k/v (f32); returns concatenated
    head contexts (Tq, D) f32.  Softmax in f32, EUP reciprocal for the denom."""
    scale = 1.0 / math.sqrt(HEAD_DIM)
    qb = q.astype(jnp.bfloat16)
    kb = k.astype(jnp.bfloat16)
    vb = v.astype(jnp.bfloat16)
    ctxs = []
    for h in range(NUM_HEADS):
        lo, hi = h * HEAD_DIM, (h + 1) * HEAD_DIM
        s = jax.lax.dot_general(qb[:, lo:hi], kb[:, lo:hi],
                                (((1,), (1,)), ((), ())),
                                preferred_element_type=jnp.float32)
        s = s * scale + bias
        s = s - jnp.max(s, axis=-1, keepdims=True)
        p = jnp.exp(s)
        p = p * pl.reciprocal(jnp.sum(p, axis=-1, keepdims=True), approx=True)
        ctxs.append(jnp.dot(p.astype(jnp.bfloat16), vb[:, lo:hi],
                            preferred_element_type=jnp.float32))
    return jnp.concatenate(ctxs, axis=1)


# ---------------- fused ResNet basic blocks ----------------
def fused_block_s1(x, bp, *, N, H, W, proj=None):
    """Stride-1 BasicBlock fused into one kernel: conv1+BN+ReLU + conv2+BN +
    residual + ReLU [+ 1x1 resnet_conv projection epilogue].
    x: (N*H*W, Cin) bf16; output bf16 (or f32 when proj is appended)."""
    R, Cin = x.shape
    Cout = bp["b1"].shape[1]
    center = (H == 1 and W == 1)
    R_img = H * W
    tile = R_img if (R_img % 16 == 0) else R

    inputs = [x, bp["w1"], bp["b1"], bp["w2"], bp["b2"]]
    if proj is not None:
        inputs += [proj[0], proj[1]]
        out_c, out_dtype = proj[1].shape[1], jnp.float32
    else:
        out_c, out_dtype = Cout, jnp.bfloat16
    tiled_in = [True] + [False] * (len(inputs) - 1)

    def kernel(*refs):
        o_ref = refs[-1]
        it = iter(refs[:-1])
        x_ref = next(it)
        w1, b1, w2, b2 = next(it), next(it), next(it), next(it)
        xx = x_ref[...].astype(jnp.float32)
        if center:
            y = jnp.maximum(jnp.dot(x_ref[...], w1[...],
                                    preferred_element_type=jnp.float32) + b1[...], 0.0)
            z = jnp.dot(y.astype(jnp.bfloat16), w2[...],
                        preferred_element_type=jnp.float32) + b2[...]
        else:
            y = jnp.maximum(_conv3x3(xx, w1, b1, H, W), 0.0)
            z = _conv3x3(y, w2, b2, H, W)
        out = jnp.maximum(z + xx, 0.0)
        if proj is not None:
            pw, pb = next(it), next(it)
            out = jnp.dot(out.astype(jnp.bfloat16), pw[...],
                          preferred_element_type=jnp.float32) + pb[...]
        o_ref[...] = out.astype(o_ref.dtype)

    return _call_tiled(kernel, jax.ShapeDtypeStruct((R, out_c), out_dtype), inputs,
                       tiled_in=tiled_in, tiled_out=True, tile=tile, rows=R)


def fused_block_s2(x4, bp, *, N, H, W):
    """Stride-2 BasicBlock (with 1x1/s2 downsample) fused into one kernel.
    conv1's stride-2 im2col and the downsample gather are bf16 JAX glue on the
    kernel input (K = 9*Cin MXU contraction); conv2 runs in-kernel via roll."""
    Cin = x4.shape[-1]
    Cout = bp["b1"].shape[1]
    Ho = (H - 1) // 2 + 1
    Wo = (W - 1) // 2 + 1
    R = N * Ho * Wo
    xp = jnp.pad(x4, ((0, 0), (1, 1), (1, 1), (0, 0)))
    cols = [xp[:, dh:dh + 2 * (Ho - 1) + 1:2, dw:dw + 2 * (Wo - 1) + 1:2, :]
            for dh in range(3) for dw in range(3)]
    p1 = jnp.stack(cols, axis=3).reshape(R, 9 * Cin)
    xd = x4[:, ::2, ::2, :].reshape(R, Cin)
    center = (Ho == 1 and Wo == 1)
    R_img = Ho * Wo
    tile = R_img if (R_img % 16 == 0) else R

    inputs = [p1, xd, bp["w1"], bp["b1"], bp["w2"], bp["b2"], bp["wd"], bp["bd"]]
    tiled_in = [True, True] + [False] * 6

    def kernel(p1_ref, xd_ref, w1, b1, w2, b2, wd, bd, o_ref):
        y = jnp.maximum(jnp.dot(p1_ref[...], w1[...],
                                preferred_element_type=jnp.float32) + b1[...], 0.0)
        if center:
            z = jnp.dot(y.astype(jnp.bfloat16), w2[...],
                        preferred_element_type=jnp.float32) + b2[...]
        else:
            z = _conv3x3(y, w2, b2, Ho, Wo)
        idn = jnp.dot(xd_ref[...], wd[...], preferred_element_type=jnp.float32) + bd[...]
        o_ref[...] = jnp.maximum(z + idn, 0.0).astype(o_ref.dtype)

    out = _call_tiled(kernel, jax.ShapeDtypeStruct((R, Cout), jnp.bfloat16), inputs,
                      tiled_in=tiled_in, tiled_out=True, tile=tile, rows=R)
    return out, Ho, Wo


def resnet_backbone(x_norm, rp):
    """Truncated _resnet_forward_impl + resnet_conv, 9 Pallas kernels total.
    x_norm: (N, H, W, 3) f32 normalized; returns ((N*Hf*Wf, BASE_DIM), Hf, Wf)."""
    N, H, W, _ = x_norm.shape

    # ---- stem: conv 7x7 / s2 / p3 (+ folded BN + ReLU) as one tiled matmul ----
    Ho = (H + 6 - 7) // 2 + 1
    Wo = (W + 6 - 7) // 2 + 1
    xb = x_norm.astype(jnp.bfloat16)
    xp = jnp.pad(xb, ((0, 0), (3, 3), (3, 3), (0, 0)))
    cols = [xp[:, dh:dh + 2 * (Ho - 1) + 1:2, dw:dw + 2 * (Wo - 1) + 1:2, :]
            for dh in range(7) for dw in range(7)]
    p1 = jnp.stack(cols, axis=3).reshape(N * Ho * Wo, 49 * 3)
    Rstem = N * Ho * Wo
    if Rstem % 128 == 0:
        stem_tile = 128
    elif (Ho * Wo) % 16 == 0:
        stem_tile = Ho * Wo
    else:
        stem_tile = Rstem

    def stem_kernel(p_ref, w_ref, b_ref, o_ref):
        o_ref[...] = jnp.maximum(
            jnp.dot(p_ref[...], w_ref[...], preferred_element_type=jnp.float32)
            + b_ref[...], 0.0).astype(o_ref.dtype)

    y = _call_tiled(stem_kernel, jax.ShapeDtypeStruct((Rstem, 64), jnp.bfloat16),
                    [p1, rp["stem_w"], rp["stem_b"]],
                    tiled_in=[True, False, False], tiled_out=True,
                    tile=stem_tile, rows=Rstem)

    # ---- maxpool 3x3/s2/p1: one XLA reduce_window (no 9x view blow-up) ----
    y4 = y.reshape(N, Ho, Wo, 64)
    Hp = (Ho + 2 - 3) // 2 + 1
    Wp = (Wo + 2 - 3) // 2 + 1
    pooled = jax.lax.reduce_window(
        y4, jnp.array(-jnp.inf, y4.dtype), jax.lax.max,
        (1, 3, 3, 1), (1, 2, 2, 1), ((0, 0), (1, 1), (1, 1), (0, 0)))

    H, W, C = Hp, Wp, 64
    x = pooled.reshape(N * H * W, C)
    x = fused_block_s1(x, rp["l1b0"], N=N, H=H, W=W)
    x = fused_block_s1(x, rp["l1b1"], N=N, H=H, W=W)

    for lname in ("l2", "l3", "l4"):
        x, H, W = fused_block_s2(x.reshape(N, H, W, C), rp[lname + "b0"], N=N, H=H, W=W)
        C = rp[lname + "b0"]["b1"].shape[1]
        proj = (rp["proj_w"], rp["proj_b"]) if lname == "l4" else None
        x = fused_block_s1(x, rp[lname + "b1"], N=N, H=H, W=W, proj=proj)
    return x, H, W


def image_embedding(images, params):
    """images: (N, H, W, 3) uint8-valued; returns (N, Hf*Wf, BASE_DIM) f32."""
    n = images.shape[0]
    x = (images.astype(jnp.float32) / 255.0 - IMAGENET_MEAN) / IMAGENET_STD
    feats, hf, wf = resnet_backbone(x, params["resnet"])
    return feats.reshape(n, hf * wf, BASE_DIM)


# ---------------- fused transformer layers ----------------
def encoder_fused(h0p, qb_col, kb_row, kv_row, ep, *, tile):
    """Embedding-LN + fused-QKV self-attention + out-proj + LN + FFN + LN,
    row-tiled over query tokens; attention mask rebuilt in-kernel from O(BS)
    per-token metadata (batch id / key-valid)."""
    L = ep["layer0"]
    A = L["self"]
    Mp, D = h0p.shape
    inputs = [h0p, h0p, qb_col, kb_row, kv_row,
              ep["emb_ln_g"], ep["emb_ln_b"],
              A["qkv_w"], A["qkv_b"], A["ow"], A["ob"],
              L["ln1_g"], L["ln1_b"],
              L["ff_w1"], L["ff_b1"], L["ff_w2"], L["ff_b2"],
              L["ln2_g"], L["ln2_b"]]
    tiled_in = [True, False, True, False, False] + [False] * 14

    def kernel(hq_ref, hk_ref, qb_ref, kb_ref, kv_ref, eg, eb_, qkvw, qkvb, ow, ob,
               l1g, l1b, fw1, fb1, fw2, fb2, l2g, l2b, o_ref):
        hq = _ln(hq_ref[...], eg[...], eb_[...])
        hk = _ln(hk_ref[...], eg[...], eb_[...])
        qkv_q = jnp.dot(hq.astype(jnp.bfloat16), qkvw[...],
                        preferred_element_type=jnp.float32) + qkvb[...]
        qkv_k = jnp.dot(hk.astype(jnp.bfloat16), qkvw[...],
                        preferred_element_type=jnp.float32) + qkvb[...]
        bias = jnp.where((qb_ref[...] == kb_ref[...]) & (kv_ref[...] > 0.5),
                         0.0, NEG_INF)
        ctx = _attend(qkv_q[:, :D], qkv_k[:, D:2 * D], qkv_k[:, 2 * D:], bias)
        attn = jnp.dot(ctx.astype(jnp.bfloat16), ow[...],
                       preferred_element_type=jnp.float32) + ob[...]
        x = _ln(hq + attn, l1g[...], l1b[...])
        f = _gelu(jnp.dot(x.astype(jnp.bfloat16), fw1[...],
                          preferred_element_type=jnp.float32) + fb1[...])
        f = jnp.dot(f.astype(jnp.bfloat16), fw2[...],
                    preferred_element_type=jnp.float32) + fb2[...]
        o_ref[...] = _ln(x + f, l2g[...], l2b[...])

    return _call_tiled(kernel, jax.ShapeDtypeStruct((Mp, D), jnp.float32), inputs,
                       tiled_in=tiled_in, tiled_out=True, tile=tile, rows=Mp)


def decoder_fused(y0p, enc_out, qmeta, kmeta, ekb_row, ekv_row, dp, *, tile):
    """Embedding-LN + causal self-attn + cross-attn + FFN + 3 LNs, row-tiled
    over decoder query tokens; causal/cross masks built in-kernel."""
    L = dp["layer0"]
    SA = L["self"]
    CA = L["cross"]
    Mpd, D = y0p.shape
    inputs = [y0p, y0p, enc_out, qmeta, kmeta, ekb_row, ekv_row,
              dp["emb_ln_g"], dp["emb_ln_b"],
              SA["qkv_w"], SA["qkv_b"], SA["ow"], SA["ob"],
              L["ln1_g"], L["ln1_b"],
              CA["q_w"], CA["q_b"], CA["kv_w"], CA["kv_b"], CA["ow"], CA["ob"],
              L["lnx_g"], L["lnx_b"],
              L["ff_w1"], L["ff_b1"], L["ff_w2"], L["ff_b2"],
              L["ln2_g"], L["ln2_b"]]
    tiled_in = [True, False, False, True, False, False, False] + [False] * 22

    def kernel(yq_ref, yk_ref, enc_ref, qm_ref, km_ref, ekb_ref, ekv_ref, eg, eb_,
               sqkvw, sqkvb, sow, sob, l1g, l1b,
               cqw, cqb, ckvw, ckvb, cow, cob, lxg, lxb,
               fw1, fb1, fw2, fb2, l2g, l2b, o_ref):
        yq = _ln(yq_ref[...], eg[...], eb_[...])
        yk = _ln(yk_ref[...], eg[...], eb_[...])
        qm = qm_ref[...]
        km = km_ref[...]
        qb, qp = qm[:, 0:1], qm[:, 1:2]
        kb, kp = km[0:1, :], km[1:2, :]
        # causal self-attention
        sqkv_q = jnp.dot(yq.astype(jnp.bfloat16), sqkvw[...],
                         preferred_element_type=jnp.float32) + sqkvb[...]
        sqkv_k = jnp.dot(yk.astype(jnp.bfloat16), sqkvw[...],
                         preferred_element_type=jnp.float32) + sqkvb[...]
        sbias = jnp.where((qb == kb) & (qp >= kp), 0.0, NEG_INF)
        sctx = _attend(sqkv_q[:, :D], sqkv_k[:, D:2 * D], sqkv_k[:, 2 * D:], sbias)
        sa = jnp.dot(sctx.astype(jnp.bfloat16), sow[...],
                     preferred_element_type=jnp.float32) + sob[...]
        y1 = _ln(yq + sa, l1g[...], l1b[...])
        # cross attention
        cq = jnp.dot(y1.astype(jnp.bfloat16), cqw[...],
                     preferred_element_type=jnp.float32) + cqb[...]
        ckv = jnp.dot(enc_ref[...].astype(jnp.bfloat16), ckvw[...],
                      preferred_element_type=jnp.float32) + ckvb[...]
        cbias = jnp.where((qb == ekb_ref[...]) & (ekv_ref[...] > 0.5), 0.0, NEG_INF)
        cctx = _attend(cq, ckv[:, :D], ckv[:, D:], cbias)
        ca = jnp.dot(cctx.astype(jnp.bfloat16), cow[...],
                     preferred_element_type=jnp.float32) + cob[...]
        y2 = _ln(y1 + ca, lxg[...], lxb[...])
        f = _gelu(jnp.dot(y2.astype(jnp.bfloat16), fw1[...],
                          preferred_element_type=jnp.float32) + fb1[...])
        f = jnp.dot(f.astype(jnp.bfloat16), fw2[...],
                    preferred_element_type=jnp.float32) + fb2[...]
        o_ref[...] = _ln(y2 + f, l2g[...], l2b[...])

    return _call_tiled(kernel, jax.ShapeDtypeStruct((Mpd, D), jnp.float32), inputs,
                       tiled_in=tiled_in, tiled_out=True, tile=tile, rows=Mpd)


def lm_head_and_loss(y, labels_col, hp, *, tile):
    """LM-head transform + LN + 128-lane-padded vocab projection + per-row
    masked NLL, row-tiled; logits never round-trip HBM for the loss terms."""
    Mp, D = y.shape
    Vp = hp["dec_w"].shape[1]
    inputs = [y, labels_col, hp["t_w"], hp["t_b"], hp["ln_g"], hp["ln_b"],
              hp["dec_w"], hp["dec_b"]]
    tiled_in = [True, True] + [False] * 6

    def kernel(y_ref, lab_ref, tw, tb, lg, lb, dw_, db_, logits_ref, nll_ref):
        z = _gelu(jnp.dot(y_ref[...].astype(jnp.bfloat16), tw[...],
                          preferred_element_type=jnp.float32) + tb[...])
        z = _ln(z, lg[...], lb[...])
        logits = jnp.dot(z.astype(jnp.bfloat16), dw_[...],
                         preferred_element_type=jnp.float32) + db_[...]
        logits_ref[...] = logits
        lab = lab_ref[...]                              # (TM, 1) int32, -100 = ignore
        valid = lab != -100
        tgt = jnp.where(valid, lab, 0)
        onehot = (jax.lax.broadcasted_iota(jnp.int32, logits.shape, 1) == tgt
                  ).astype(jnp.float32)
        mx = jnp.max(logits, axis=-1, keepdims=True)
        lse = mx + jnp.log(jnp.sum(jnp.exp(logits - mx), axis=-1, keepdims=True))
        nll = lse - jnp.sum(logits * onehot, axis=-1, keepdims=True)
        nll_ref[...] = nll * valid.astype(jnp.float32)

    out_shapes = (jax.ShapeDtypeStruct((Mp, Vp), jnp.float32),
                  jax.ShapeDtypeStruct((Mp, 1), jnp.float32))
    return _call_tiled(kernel, out_shapes, inputs, tiled_in=tiled_in,
                       tiled_out=(True, True), tile=tile, rows=Mp)


# ---------------- full forward ----------------
def seqseq_forward(params, input_ids, input_images, input_images_enabled, labels):
    B, S_lang = input_ids.shape
    D = BASE_DIM

    # Host-side length bookkeeping happens up-front, before any device work is
    # enqueued (mirrors the PyTorch `.max().item()` without a mid-forward sync).
    ids_np = np.asarray(input_ids)
    tok_counts = (ids_np != PAD_ID).sum(axis=1).astype(np.int32)

    emb_lang = jnp.take(params["enc"]["word_emb"], input_ids, axis=0)   # (B, S_lang, D)

    if input_images is None:
        inputs_embeds = emb_lang
        mask_np = ids_np != PAD_ID
    else:
        if input_images_enabled is None:
            enabled_np = np.ones((B,), np.bool_)
        else:
            enabled_np = np.asarray(input_images_enabled).astype(np.bool_)
        emb_img = image_embedding(input_images, params)                 # (B, len_img, D)
        len_img = emb_img.shape[1]
        len_total = enabled_np.astype(np.int32) * len_img + tok_counts
        overall_len = int(len_total.max())
        delta = overall_len - len_img
        # TODO(synk): like the reference, this placement assumes delta <= S_lang.
        m = jnp.asarray(enabled_np)[:, None, None].astype(jnp.float32)
        pad = jnp.zeros((B, delta, D), jnp.float32)
        inputs_embeds = jnp.concatenate([m * emb_img, pad], axis=1)
        inputs_embeds = inputs_embeds.at[:, :S_lang].add((1.0 - m) * emb_lang)
        inputs_embeds = inputs_embeds.at[:, overall_len - delta:].add(m * emb_lang[:, :delta])
        mask_np = np.arange(overall_len)[None, :] < len_total[:, None]

    S = inputs_embeds.shape[1]
    mask = jnp.asarray(mask_np)
    M = B * S

    # labels.masked_fill_(pad, -100) + shift_tokens_right
    labels = jnp.where(labels == PAD_ID, -100, labels)
    T = labels.shape[1]
    dec_in = jnp.concatenate(
        [jnp.full((B, 1), DECODER_START_ID, labels.dtype), labels[:, :-1]], axis=1)
    dec_in = jnp.where(dec_in == -100, PAD_ID, dec_in)

    TM = 8                                   # query-row tile for transformer kernels
    Mp = _round_up(M, TM)

    # O(B*S) per-token metadata (host numpy glue); masks are rebuilt in-kernel.
    enc_bid = np.full((Mp,), -1, np.int32)
    enc_bid[:M] = np.repeat(np.arange(B), S)
    enc_valid = np.zeros((Mp,), np.float32)
    enc_valid[:M] = mask_np.reshape(-1).astype(np.float32)
    qb_col = jnp.asarray(enc_bid.reshape(Mp, 1))
    kb_row = jnp.asarray(enc_bid.reshape(1, Mp))
    kv_row = jnp.asarray(enc_valid.reshape(1, Mp))

    # --- encoder (one fused, row-tiled Pallas kernel) ---
    ep = params["enc"]
    h0 = inputs_embeds + ep["pos_emb"][:S][None] + ep["type_emb"][0][None, None]
    h0p = _pad_rows(h0.reshape(M, D), Mp)
    enc_out = encoder_fused(h0p, qb_col, kb_row, kv_row, ep, tile=TM)   # (Mp, D)

    # --- decoder (one fused, row-tiled Pallas kernel) ---
    dp = params["dec"]
    Md = B * T
    Mpd = _round_up(Md, TM)
    dec_bid = np.full((Mpd,), -1, np.int32)
    dec_bid[:Md] = np.repeat(np.arange(B), T)
    dec_pos = np.zeros((Mpd,), np.int32)
    dec_pos[:Md] = np.tile(np.arange(T), B)
    qmeta = jnp.asarray(np.stack([dec_bid, dec_pos], axis=1).astype(np.int32))  # (Mpd, 2)
    kmeta = jnp.asarray(np.stack([dec_bid, dec_pos], axis=0).astype(np.int32))  # (2, Mpd)

    y0 = jnp.take(dp["word_emb"], dec_in, axis=0) + dp["pos_emb"][:T][None]
    y0p = _pad_rows(y0.reshape(Md, D), Mpd)
    dec_out = decoder_fused(y0p, enc_out, qmeta, kmeta, kb_row, kv_row, dp, tile=TM)

    # --- LM head + per-row masked NLL (one fused, row-tiled Pallas kernel) ---
    labels_flat = labels.reshape(Md, 1).astype(jnp.int32)
    if Mpd > Md:
        labels_flat = jnp.pad(labels_flat, ((0, Mpd - Md), (0, 0)), constant_values=-100)
    logits_p, nll = lm_head_and_loss(dec_out, labels_flat, params["lm_head"], tile=TM)

    logits = logits_p[:Md, :VOCAB].reshape(B, T, VOCAB)
    # TODO(synk): final scalar mean over valid tokens is a trivial XLA reduce.
    den = jnp.maximum(jnp.sum((labels != -100).astype(jnp.float32)), 1.0)
    loss = jnp.sum(nll) / den

    return {"loss": loss,
            "logits": logits,
            "inputs_embeds": inputs_embeds,
            "attention_mask": mask}


# ---------------- deterministic parameter init (raw, torch-like layout) ----------------
class _KeyGen:
    def __init__(self, key):
        self._key = key

    def __call__(self):
        self._key, sub = jax.random.split(self._key)
        return sub


def _w(nk, shape, scale=0.02):
    return scale * jax.random.normal(nk(), shape, jnp.float32)


def _bn_params(nk, c):
    return dict(gamma=1.0 + _w(nk, (c,)), beta=_w(nk, (c,)),
                mean=jnp.zeros((c,), jnp.float32), var=jnp.ones((c,), jnp.float32))


def _block_params(nk, cin, cout, downsample):
    p = dict(conv1_w=_w(nk, (3, 3, cin, cout)), bn1=_bn_params(nk, cout),
             conv2_w=_w(nk, (3, 3, cout, cout)), bn2=_bn_params(nk, cout))
    if downsample:
        p["down_w"] = _w(nk, (1, 1, cin, cout))
        p["down_bn"] = _bn_params(nk, cout)
    return p


def _ln_params(nk, d):
    return dict(gamma=jnp.ones((d,), jnp.float32), beta=jnp.zeros((d,), jnp.float32))


def _attn_params(nk, d):
    z = jnp.zeros((d,), jnp.float32)
    return dict(q_w=_w(nk, (d, d)), q_b=z, k_w=_w(nk, (d, d)), k_b=z,
                v_w=_w(nk, (d, d)), v_b=z, o_w=_w(nk, (d, d)), o_b=z)


def _layer_params(nk, d, cross=False):
    p = dict(self=_attn_params(nk, d), ln1=_ln_params(nk, d),
             ff_w1=_w(nk, (d, FFN_DIM)), ff_b1=jnp.zeros((FFN_DIM,), jnp.float32),
             ff_w2=_w(nk, (FFN_DIM, d)), ff_b2=jnp.zeros((d,), jnp.float32),
             ln2=_ln_params(nk, d))
    if cross:
        p["cross"] = _attn_params(nk, d)
        p["ln_x"] = _ln_params(nk, d)
    return p


def init_params(key):
    nk = _KeyGen(key)
    resnet = dict(
        conv1_w=_w(nk, (7, 7, 3, 64)), bn1=_bn_params(nk, 64),
        layer1=[_block_params(nk, 64, 64, False), _block_params(nk, 64, 64, False)],
        layer2=[_block_params(nk, 64, 128, True), _block_params(nk, 128, 128, False)],
        layer3=[_block_params(nk, 128, 256, True), _block_params(nk, 256, 256, False)],
        layer4=[_block_params(nk, 256, 512, True), _block_params(nk, 512, 512, False)])
    enc = dict(word_emb=_w(nk, (VOCAB, BASE_DIM)), pos_emb=_w(nk, (MAX_POS, BASE_DIM)),
               type_emb=_w(nk, (1, BASE_DIM)), emb_ln=_ln_params(nk, BASE_DIM),
               layer0=_layer_params(nk, BASE_DIM, cross=False))
    dec = dict(word_emb=_w(nk, (VOCAB, BASE_DIM)), pos_emb=_w(nk, (MAX_POS, BASE_DIM)),
               emb_ln=_ln_params(nk, BASE_DIM),
               layer0=_layer_params(nk, BASE_DIM, cross=True))
    lm_head = dict(t_w=_w(nk, (BASE_DIM, BASE_DIM)), t_b=jnp.zeros((BASE_DIM,), jnp.float32),
                   ln=_ln_params(nk, BASE_DIM),
                   dec_w=_w(nk, (BASE_DIM, VOCAB)), dec_b=jnp.zeros((VOCAB,), jnp.float32))
    return dict(resnet=resnet,
                resnet_conv_w=_w(nk, (512, BASE_DIM)),
                resnet_conv_b=jnp.zeros((BASE_DIM,), jnp.float32),
                enc=enc, dec=dec, lm_head=lm_head)


# -------- parameter prep: fold eval BN, bf16 MXU weights, fused QKV, padded vocab --------
def prepare_params(raw):
    def fold(w, bn):
        s = bn["gamma"] / jnp.sqrt(bn["var"] + BN_EPS)
        return w * s, bn["beta"] - bn["mean"] * s

    def block_s1_prep(bp, center):
        w1, b1 = fold(bp["conv1_w"], bp["bn1"])
        w2, b2 = fold(bp["conv2_w"], bp["bn2"])
        cin, cout = w1.shape[2], w1.shape[3]
        if center:                    # 1x1 spatial: only the 3x3 center tap is used
            w1p, w2p = w1[1, 1], w2[1, 1]
        else:                         # (3, 3*Cin, Cout): 3 taps stacked on K per matmul
            w1p = w1.reshape(3, 3 * cin, cout)
            w2p = w2.reshape(3, 3 * cout, cout)
        return dict(w1=w1p.astype(jnp.bfloat16), b1=b1.reshape(1, -1),
                    w2=w2p.astype(jnp.bfloat16), b2=b2.reshape(1, -1))

    def block_s2_prep(bp, center2):
        w1, b1 = fold(bp["conv1_w"], bp["bn1"])
        w2, b2 = fold(bp["conv2_w"], bp["bn2"])
        wd, bd = fold(bp["down_w"], bp["down_bn"])
        cin, cout = w1.shape[2], w1.shape[3]
        w1p = w1.reshape(9 * cin, cout)
        w2p = w2[1, 1] if center2 else w2.reshape(3, 3 * cout, cout)
        wdp = wd.reshape(cin, cout)
        return dict(w1=w1p.astype(jnp.bfloat16), b1=b1.reshape(1, -1),
                    w2=w2p.astype(jnp.bfloat16), b2=b2.reshape(1, -1),
                    wd=wdp.astype(jnp.bfloat16), bd=bd.reshape(1, -1))

    rn = raw["resnet"]
    sw, sb = fold(rn["conv1_w"], rn["bn1"])
    resnet = dict(
        stem_w=sw.reshape(49 * 3, 64).astype(jnp.bfloat16), stem_b=sb.reshape(1, 64),
        l1b0=block_s1_prep(rn["layer1"][0], False),
        l1b1=block_s1_prep(rn["layer1"][1], False),
        l2b0=block_s2_prep(rn["layer2"][0], False),
        l2b1=block_s1_prep(rn["layer2"][1], False),
        l3b0=block_s2_prep(rn["layer3"][0], False),
        l3b1=block_s1_prep(rn["layer3"][1], False),
        l4b0=block_s2_prep(rn["layer4"][0], True),
        l4b1=block_s1_prep(rn["layer4"][1], True),
        proj_w=raw["resnet_conv_w"].astype(jnp.bfloat16),
        proj_b=raw["resnet_conv_b"].reshape(1, -1))

    def attn_self_prep(ap):
        qkv_w = jnp.concatenate([ap["q_w"], ap["k_w"], ap["v_w"]], axis=1)
        qkv_b = jnp.concatenate([ap["q_b"], ap["k_b"], ap["v_b"]], axis=0)
        return dict(qkv_w=qkv_w.astype(jnp.bfloat16), qkv_b=qkv_b.reshape(1, -1),
                    ow=ap["o_w"].astype(jnp.bfloat16), ob=ap["o_b"].reshape(1, -1))

    def attn_cross_prep(ap):
        kv_w = jnp.concatenate([ap["k_w"], ap["v_w"]], axis=1)
        kv_b = jnp.concatenate([ap["k_b"], ap["v_b"]], axis=0)
        return dict(q_w=ap["q_w"].astype(jnp.bfloat16), q_b=ap["q_b"].reshape(1, -1),
                    kv_w=kv_w.astype(jnp.bfloat16), kv_b=kv_b.reshape(1, -1),
                    ow=ap["o_w"].astype(jnp.bfloat16), ob=ap["o_b"].reshape(1, -1))

    def ln_prep(lp):
        return lp["gamma"].reshape(1, -1), lp["beta"].reshape(1, -1)

    def layer_prep(lp, cross):
        d = dict(self=attn_self_prep(lp["self"]))
        d["ln1_g"], d["ln1_b"] = ln_prep(lp["ln1"])
        d["ff_w1"], d["ff_b1"] = lp["ff_w1"].astype(jnp.bfloat16), lp["ff_b1"].reshape(1, -1)
        d["ff_w2"], d["ff_b2"] = lp["ff_w2"].astype(jnp.bfloat16), lp["ff_b2"].reshape(1, -1)
        d["ln2_g"], d["ln2_b"] = ln_prep(lp["ln2"])
        if cross:
            d["cross"] = attn_cross_prep(lp["cross"])
            d["lnx_g"], d["lnx_b"] = ln_prep(lp["ln_x"])
        return d

    enc = dict(word_emb=raw["enc"]["word_emb"], pos_emb=raw["enc"]["pos_emb"],
               type_emb=raw["enc"]["type_emb"])
    enc["emb_ln_g"], enc["emb_ln_b"] = ln_prep(raw["enc"]["emb_ln"])
    enc["layer0"] = layer_prep(raw["enc"]["layer0"], cross=False)

    dec = dict(word_emb=raw["dec"]["word_emb"], pos_emb=raw["dec"]["pos_emb"])
    dec["emb_ln_g"], dec["emb_ln_b"] = ln_prep(raw["dec"]["emb_ln"])
    dec["layer0"] = layer_prep(raw["dec"]["layer0"], cross=True)

    # vocab projection padded to 128 lanes; padded logits biased to -1e9 so they
    # never affect the in-kernel LSE, and are sliced off outside.
    dec_w_p = jnp.concatenate(
        [raw["lm_head"]["dec_w"],
         jnp.zeros((BASE_DIM, VOCAB_PAD - VOCAB), jnp.float32)], axis=1)
    dec_b_p = jnp.concatenate(
        [raw["lm_head"]["dec_b"],
         jnp.full((VOCAB_PAD - VOCAB,), NEG_INF, jnp.float32)], axis=0)
    head = dict(t_w=raw["lm_head"]["t_w"].astype(jnp.bfloat16),
                t_b=raw["lm_head"]["t_b"].reshape(1, -1),
                dec_w=dec_w_p.astype(jnp.bfloat16),
                dec_b=dec_b_p.reshape(1, VOCAB_PAD))
    head["ln_g"], head["ln_b"] = ln_prep(raw["lm_head"]["ln"])

    return dict(resnet=resnet, enc=enc, dec=dec, lm_head=head)


if __name__ == "__main__":
    raw_params = init_params(jax.random.PRNGKey(0))
    params = prepare_params(raw_params)
    img_key = jax.random.split(jax.random.PRNGKey(0), 2)[1]

    B, SEQ, TOUT = 2, 8, 6
    H, W = IMG_SIZE
    input_ids = jnp.array([[5, 9, 12, 7, 33, 21, 14, 8],
                           [11, 6, 40, 22, 9, 17, PAD_ID, PAD_ID]], jnp.int32)
    input_images = jax.random.randint(img_key, (B, H, W, 3), 0, 256, jnp.int32).astype(jnp.uint8)
    labels = jnp.array([[13, 25, 7, 31, 3, PAD_ID],
                        [9, 44, 12, 3, PAD_ID, PAD_ID]], jnp.int32)

    out = seqseq_forward(params, input_ids, input_images, None, labels)
    jax.block_until_ready(out["loss"])

    assert out["logits"].shape == (B, TOUT, VOCAB)
    assert out["inputs_embeds"].shape[0] == B and out["inputs_embeds"].shape[-1] == BASE_DIM
    assert bool(jnp.isfinite(out["loss"]))
    print("KERNEL_OK")
</pallas_src>

<mosaic_0001>
module attributes {stable_mosaic.version = 11 : i64} {
  func.func @stem_kernel(%arg0: i32, %arg1: memref<128x147xbf16, #tpu.memory_space<vmem>>, %arg2: memref<147x64xbf16, #tpu.memory_space<vmem>>, %arg3: memref<1x64xf32, #tpu.memory_space<vmem>>, %arg4: memref<128x64xbf16, #tpu.memory_space<vmem>>) attributes {dimension_semantics = [#tpu.dimension_semantics<parallel>], iteration_bounds = array<i64: 4>, scalar_prefetch = 0 : i64, scratch_operands = 0 : i64, tpu.core_type = #tpu.core_type<tc>, window_params = [{transform_indices = @transform_0, window_bounds = array<i64: 128, 147>}, {pipeline_mode = #tpu.pipeline_mode<synchronous>, transform_indices = @transform_1, window_bounds = array<i64: 147, 64>}, {pipeline_mode = #tpu.pipeline_mode<synchronous>, transform_indices = @transform_2, window_bounds = array<i64: 1, 64>}, {transform_indices = @transform_3, window_bounds = array<i64: 128, 64>}]} {
    %c0 = arith.constant 0 : index
    %c0_0 = arith.constant 0 : index
    %0 = vector.load %arg1[%c0, %c0_0] : memref<128x147xbf16, #tpu.memory_space<vmem>>, vector<128x147xbf16>
    %c0_1 = arith.constant 0 : index
    %c0_2 = arith.constant 0 : index
    %1 = vector.load %arg2[%c0_1, %c0_2] : memref<147x64xbf16, #tpu.memory_space<vmem>>, vector<147x64xbf16>
    %cst = arith.constant dense<0.000000e+00> : vector<128x64xf32>
    %2 = tpu.matmul %0, %1, %cst {dimension_numbers = #tpu.dot_dimension_numbers<[1], [0], [0], [1], [0, 0, 1, 1], [], []>} : vector<128x147xbf16>, vector<147x64xbf16>, vector<128x64xf32> -> vector<128x64xf32>
    %c0_3 = arith.constant 0 : index
    %c0_4 = arith.constant 0 : index
    %3 = vector.load %arg3[%c0_3, %c0_4] : memref<1x64xf32, #tpu.memory_space<vmem>>, vector<1x64xf32>
    %4 = vector.broadcast %3 : vector<1x64xf32> to vector<128x64xf32>
    %5 = arith.addf %2, %4 : vector<128x64xf32>
    %cst_5 = arith.constant 0.000000e+00 : f32
    %6 = vector.broadcast %cst_5 : f32 to vector<128x64xf32>
    %7 = arith.maximumf %5, %6 : vector<128x64xf32>
    %8 = arith.truncf %7 : vector<128x64xf32> to vector<128x64xbf16>
    %c0_6 = arith.constant 0 : index
    %c0_7 = arith.constant 0 : index
    %9 = vector.load %arg4[%c0_6, %c0_7] : memref<128x64xbf16, #tpu.memory_space<vmem>>, vector<128x64xbf16>
    tpu.vector_store %arg4[%c0_6, %c0_7], %8 {strides = array<i32>} : memref<128x64xbf16, #tpu.memory_space<vmem>>, vector<128x64xbf16>,
    return
  }
  func.func @transform_0(%arg0: i32) -> (i32, i32) {
    %c0_i32 = arith.constant 0 : i32
    %c0_i32_0 = arith.constant 0 : i32
    return %arg0, %c0_i32 : i32, i32
  }
  func.func @transform_1(%arg0: i32) -> (i32, i32) {
    %c0_i32 = arith.constant 0 : i32
    %c0_i32_0 = arith.constant 0 : i32
    %c0_i32_1 = arith.constant 0 : i32
    return %c0_i32, %c0_i32_0 : i32, i32
  }
  func.func @transform_2(%arg0: i32) -> (i32, i32) {
    %c0_i32 = arith.constant 0 : i32
    %c0_i32_0 = arith.constant 0 : i32
    %c0_i32_1 = arith.constant 0 : i32
    return %c0_i32, %c0_i32_0 : i32, i32
  }
  func.func @transform_3(%arg0: i32) -> (i32, i32) {
    %c0_i32 = arith.constant 0 : i32
    %c0_i32_0 = arith.constant 0 : i32
    return %arg0, %c0_i32 : i32, i32
  }
}

</mosaic_0001>

<bundles_post_ra>
// kernel: tpu_custom_call.1
= control target key start
LH: loop header
LB: loop body
LE: loop exit
PB: predicated region body
PF: predicated region fallthrough
CT: control target
= control target key end

     0   :  { %s805_s12 = smov 0   ;;  %s937_s0 = inlined_call_operand.vmem [shape: bf16[512,147], index: 0, kind: input, shape index: {}]   ;;  %s938_s1 = inlined_call_operand.vmem [shape: bf16[147,64], index: 1, kind: input, shape index: {}]   ;;  %s939_s2 = inlined_call_operand.vmem [shape: f32[1,64], index: 2, kind: input, shape index: {}]   ;;  %s940_s3 = inlined_call_operand.vmem [shape: bf16[512,64], index: 3, kind: output, shape index: {}]  }
   0x1 LB: > { %s631_s13 = sadd.s32 4294967295, %s781_s12   ;;  %p635_p0 = scmp.ge.s32.totalorder %s781_s12, 1  ;;  %s781_s12 = sphi %s805_s12, %s13_s12  }
   0x2   : > { %p139_p1 = scmp.lt.s32.totalorder %s781_s12, 5 }
   0x4   : > { %p140_p2 = pnand %p635_p0, %p139_p1 }
   0x5   : > { %v741_v0 = vld [vmem:[%s938_s1] sm:$0xff] (!%p140_p2)   ;;  %v783_v1 = vmov (!%p140_p2), 0   ;;  %v742_v2 = vld [vmem:[%s938_s1 + $0x8] sm:$0xff] (!%p140_p2)   ;;  %v743_v3 = vld [vmem:[%s938_s1 + $0x10] sm:$0xff] (!%p140_p2)   ;;  %s636_s20 = sshll.u32 (!%p140_p2), %s631_s13, 4  ;;  %vm349_vm0 = vcmask (!%p140_p2), 154624  }
   0x6   : > { %143 = sbr.rel (%p140_p2) target bundleno = 291 (0x123), region = 32  ;;  %381 = vmatprep.subr.bf16.mxu0 (!%p140_p2), %v783_v1  ;;  %711 = vmatprep.subr.bf16.mxu1 (!%p140_p2), %v783_v1  ;;  %p165_p3 = scmp.lt.s32.totalorder (!%p140_p2), %s636_s20, 63  ;;  %v744_v4 = vld [vmem:[%s938_s1 + $0x18] sm:$0xff] (!%p140_p2)   ;;  %v745_v5 = vld [vmem:[%s938_s1 + $0x20] sm:$0xff] (!%p140_p2)   ;;  %v746_v8 = vld [vmem:[%s938_s1 + $0x28] sm:$0xff] (!%p140_p2)   ;;  %vm374_vm1 = vcmask (!%p140_p2), 1040384  }
   0x7   : > { %382 = vmatpush1.bf16.msra.mxu0 (!%p140_p2), %v741_v0  ;;  %721 = vmatpush1.bf16.msra.mxu1 (!%p140_p2), %v741_v0  ;;  %v747_v9 = vld [vmem:[%s938_s1 + $0x30] sm:$0xff] (!%p140_p2)   ;;  %v748_v10 = vld [vmem:[%s938_s1 + $0x38] sm:$0xff] (!%p140_p2)   ;;  %vm375_vm2 = vcmask (!%p140_p2), 1041408   ;;  %v784_v11 = vmov (!%p140_p2), 65535   ;;  %v749_v13 = vld [vmem:[%s938_s1 + $0x40] sm:$0xff] (!%p140_p2)   ;;  %vm558_vm3 = vcmask (!%p140_p2), 519168  }
   0x8   : > { %383 = vmatprep.subr.bf16.mxu0 (!%p140_p2), %v783_v1  ;;  %712 = vmatprep.subr.bf16.mxu1 (!%p140_p2), %v783_v1  ;;  %v376_v12 = vsel (!%p140_p2), %vm374_vm1, 4294967295, %v784_v11  ;;  %v750_v14 = vld [vmem:[%s938_s1 + $0x48] ss:$0 sps:$4 sm:$0x33] (!%p140_p2)   ;;  %v878_v31 = vld [vmem:[%s939_s2] ss:$0 sm:$0xff] (!%p140_p2) }
   0x9   : > { %v377_v15 = vsel (!%p140_p2), %vm375_vm2, %v376_v12, 0 }
   0xa   : > { %v379_v16 = vand.u32 (!%p140_p2), %v750_v14, %v377_v15 }
   0xb   : > { %384 = vmatpush1.bf16.msra.mxu0 (!%p140_p2), %v742_v2  ;;  %722 = vmatpush1.bf16.msra.mxu1 (!%p140_p2), %v742_v2 }
   0xc   : > { %385 = vmatprep.subr.bf16.mxu0 (!%p140_p2), %v783_v1  ;;  %713 = vmatprep.subr.bf16.mxu1 (!%p140_p2), %v783_v1 }
   0xd   : > { %s942_s20 = smov (!%p165_p3, %s636_s20), 63 }
   0xe   : > { %s694_s23 = sshll.u32 %s942_s20, 3  ;;  %s640_s15 = sshll.u32 %s942_s20, 2 }
   0xf   : > { %386 = vmatpush1.bf16.msra.mxu0 %v743_v3  ;;  %723 = vmatpush1.bf16.msra.mxu1 %v743_v3  ;;  %s831_s26 = scalar_lea.vmem %s937_s0, %s694_s23  ;;  %s888_s18 = scalar_lea.vmem %s940_s3, %s640_s15 }
  0x10   : > { %387 = vmatprep.subr.bf16.mxu0 %v783_v1  ;;  %714 = vmatprep.subr.bf16.mxu1 %v783_v1  ;;  %v753_v6 = vld [vmem:[%s831_s26 + $0x4] ss:$8 sps:$4 sm:$0xff]   ;;  %v751_v17 = vld [vmem:[%s831_s26] ss:$8 sps:$4 sm:$0xff]   ;;  %v757_v19 = vld [vmem:[%s831_s26 + $0x14] ss:$8 sps:$4 sm:$0xff]  }
  0x11   : > { %v756_v7 = vld [vmem:[%s831_s26 + $0x44] ss:$8 sps:$4 sm:$0xff]   ;;  %668 = vmatprep.mubr.msk.bf16.mxu0 %vm349_vm0, %v753_v6  ;;  %v754_v18 = vld [vmem:[%s831_s26 + $0x40] ss:$8 sps:$4 sm:$0xff]   ;;  %v759_v20 = vld [vmem:[%s831_s26 + $0x54] ss:$8 sps:$4 sm:$0xff]  }
  0x12   : > { %672 = vmatprep.mubr.msk.bf16.mxu1 %vm349_vm0, %v756_v7  ;;  %v761_v21 = vld [vmem:[%s831_s26 + $0x10] ss:$8 sps:$4 sm:$0xff]   ;;  %v763_v23 = vld [vmem:[%s831_s26 + $0x24] ss:$8 sps:$4 sm:$0xff]   ;;  %v767_v25 = vld [vmem:[%s831_s26 + $0x20] ss:$8 sps:$4 sm:$0xff]  }
  0x13   : > { %388 = vmatpush1.bf16.msra.mxu0 %v744_v4  ;;  %724 = vmatpush1.bf16.msra.mxu1 %v744_v4  ;;  %v762_v22 = vld [vmem:[%s831_s26 + $0x50] ss:$8 sps:$4 sm:$0xff]   ;;  %v765_v24 = vld [vmem:[%s831_s26 + $0x64] ss:$8 sps:$4 sm:$0xff]   ;;  %v768_v26 = vld [vmem:[%s831_s26 + $0x60] ss:$8 sps:$4 sm:$0xff]  }
  0x14   : > { %389 = vmatprep.subr.bf16.mxu0 %v783_v1  ;;  %715 = vmatprep.subr.bf16.mxu1 %v783_v1  ;;  %v769_v27 = vld [vmem:[%s831_s26 + $0x34] ss:$8 sps:$4 sm:$0xff]   ;;  %v773_v29 = vld [vmem:[%s831_s26 + $0x30] ss:$8 sps:$4 sm:$0xff]  }
  0x15   : > { %v771_v28 = vld [vmem:[%s831_s26 + $0x74] ss:$8 sps:$4 sm:$0xff]   ;;  %v774_v30 = vld [vmem:[%s831_s26 + $0x70] ss:$8 sps:$4 sm:$0xff]  }
  0x17   : > { %390 = vmatpush1.bf16.msra.mxu0 %v745_v5  ;;  %725 = vmatpush1.bf16.msra.mxu1 %v745_v5 }
  0x18   : > { %391 = vmatprep.subr.bf16.mxu0 %v783_v1  ;;  %716 = vmatprep.subr.bf16.mxu1 %v783_v1 }
  0x1b   : > { %392 = vmatpush1.bf16.msra.mxu0 %v746_v8  ;;  %726 = vmatpush1.bf16.msra.mxu1 %v746_v8 }
  0x1c   : > { %393 = vmatprep.subr.bf16.mxu0 %v783_v1  ;;  %717 = vmatprep.subr.bf16.mxu1 %v783_v1 }
  0x1f   : > { %394 = vmatpush1.bf16.msra.mxu0 %v747_v9  ;;  %727 = vmatpush1.bf16.msra.mxu1 %v747_v9 }
  0x20   : > { %395 = vmatprep.subr.bf16.mxu0 %v783_v1  ;;  %718 = vmatprep.subr.bf16.mxu1 %v783_v1 }
  0x23   : > { %396 = vmatpush1.bf16.msra.mxu0 %v748_v10  ;;  %728 = vmatpush1.bf16.msra.mxu1 %v748_v10 }
  0x24   : > { %397 = vmatprep.subr.bf16.mxu0 %v783_v1  ;;  %719 = vmatprep.subr.bf16.mxu1 %v783_v1 }
  0x27   : > { %398 = vmatpush1.bf16.msra.mxu0 %v749_v13  ;;  %729 = vmatpush1.bf16.msra.mxu1 %v749_v13 }
  0x28   : > { %399 = vmatprep.subr.bf16.mxu0 %v783_v1  ;;  %720 = vmatprep.subr.bf16.mxu1 %v783_v1 }
  0x2b   : > { %400 = vmatpush1.bf16.msra.mxu0 %v379_v16  ;;  %730 = vmatpush1.bf16.msra.mxu1 %v379_v16 }
  0x2e   : > { %414 = vmatmul.mubr.bf16.vlgmr.msra.gmra.mrb[0].mxu0 %v751_v17  ;;  %446 = vmatmul.mubr.bf16.vlgmr.msra.gmra.mrb[0].mxu1 %v754_v18 }
  0x2f   : > { %669 = vmatprep.mubr.msk.bf16.mxu0 %vm349_vm0, %v757_v19  ;;  %673 = vmatprep.mubr.msk.bf16.mxu1 %vm349_vm0, %v759_v20 }
  0x36   : > { %422 = vmatmul.mubr.bf16.gmra.mrb[4].mxu0 %v761_v21  ;;  %454 = vmatmul.mubr.bf16.gmra.mrb[4].mxu1 %v762_v22 }
  0x37   : > { %670 = vmatprep.mubr.msk.bf16.mxu0 %vm349_vm0, %v763_v23  ;;  %674 = vmatprep.mubr.msk.bf16.mxu1 %vm349_vm0, %v765_v24 }
  0x3e   : > { %430 = vmatmul.mubr.bf16.gmra.mrb[8].mxu0 %v767_v25  ;;  %462 = vmatmul.mubr.bf16.gmra.mrb[8].mxu1 %v768_v26 }
  0x3f   : > { %671 = vmatprep.mubr.msk.bf16.mxu0 %vm349_vm0, %v769_v27  ;;  %675 = vmatprep.mubr.msk.bf16.mxu1 %vm349_vm0, %v771_v28 }
  0x46   : > { %438 = vmatmul.mubr.bf16.gmra.mrb[12].mxu0 %v773_v29  ;;  %470 = vmatmul.mubr.bf16.gmra.mrb[12].mxu1 %v774_v30 }
 0x101   : > { %v415_v32 = vpop.f32.mrb[0].mxu0  ;;  %v447_v33 = vpop.f32.mrb[0].mxu1 }
 0x102   : > { %v416_v34 = vadd.f32 %v878_v31, %v415_v32  ;;  %v448_v35 = vadd.f32 %v878_v31, %v447_v33  ;;  %v417_v36 = vpop.f32.mrb[1].mxu0  ;;  %v449_v37 = vpop.f32.mrb[1].mxu1 }
 0x103   : > { %v418_v38 = vpop.f32.mrb[2].mxu0  ;;  %v450_v39 = vpop.f32.mrb[2].mxu1 }
 0x104   : > { %v478_v40 = vmax.f32 %v416_v34, 0.0  ;;  %v486_v41 = vmax.f32 %v448_v35, 0.0  ;;  %v419_v42 = vadd.f32 %v878_v31, %v418_v38  ;;  %v451_v43 = vadd.f32 %v878_v31, %v450_v39  ;;  %v420_v44 = vpop.f32.mrb[3].mxu0  ;;  %v452_v45 = vpop.f32.mrb[3].mxu1 }
 0x106   : > { %v695_v46 = vpack.c.bf16 %v478_v40, %v478_v40  ;;  %v703_v47 = vpack.c.bf16 %v486_v41, %v486_v41  ;;  %v479_v48 = vmax.f32 %v419_v42, 0.0  ;;  %v487_v49 = vmax.f32 %v451_v43, 0.0 }
 0x108   : > { %559 = vst.msk [vmem:[%s888_s18] sm:$0xf] %vm558_vm3, %v695_v46  ;;  %567 = vst.msk [vmem:[%s888_s18 + $0x20] sm:$0xf] %vm558_vm3, %v703_v47  ;;  %v696_v50 = vpack.c.bf16 %v479_v48, %v479_v48  ;;  %v704_v51 = vpack.c.bf16 %v487_v49, %v487_v49 }
 0x109   : > { %v423_v52 = vpop.f32.mrb[4].mxu0  ;;  %v455_v53 = vpop.f32.mrb[4].mxu1 }
 0x10a   : > { %560 = vst.msk [vmem:[%s888_s18 + $0x4] sm:$0xf] %vm558_vm3, %v696_v50  ;;  %568 = vst.msk [vmem:[%s888_s18 + $0x24] sm:$0xf] %vm558_vm3, %v704_v51  ;;  %v424_v54 = vadd.f32 %v878_v31, %v423_v52  ;;  %v456_v55 = vadd.f32 %v878_v31, %v455_v53  ;;  %v425_v56 = vpop.f32.mrb[5].mxu0  ;;  %v457_v57 = vpop.f32.mrb[5].mxu1 }
 0x10b   : > { %v426_v58 = vpop.f32.mrb[6].mxu0  ;;  %v458_v59 = vpop.f32.mrb[6].mxu1 }
 0x10c   : > { %v480_v60 = vmax.f32 %v424_v54, 0.0  ;;  %v488_v61 = vmax.f32 %v456_v55, 0.0  ;;  %v427_v62 = vadd.f32 %v878_v31, %v426_v58  ;;  %v459_v63 = vadd.f32 %v878_v31, %v458_v59  ;;  %v428_v0 = vpop.f32.mrb[7].mxu0  ;;  %v460_v1 = vpop.f32.mrb[7].mxu1 }
 0x10e   : > { %v697_v2 = vpack.c.bf16 %v480_v60, %v480_v60  ;;  %v705_v3 = vpack.c.bf16 %v488_v61, %v488_v61  ;;  %v481_v4 = vmax.f32 %v427_v62, 0.0  ;;  %v489_v5 = vmax.f32 %v459_v63, 0.0 }
 0x110   : > { %561 = vst.msk [vmem:[%s888_s18 + $0x8] sm:$0xf] %vm558_vm3, %v697_v2  ;;  %569 = vst.msk [vmem:[%s888_s18 + $0x28] sm:$0xf] %vm558_vm3, %v705_v3  ;;  %v698_v6 = vpack.c.bf16 %v481_v4, %v481_v4  ;;  %v706_v7 = vpack.c.bf16 %v489_v5, %v489_v5 }
 0x111   : > { %v431_v8 = vpop.f32.mrb[8].mxu0  ;;  %v463_v9 = vpop.f32.mrb[8].mxu1 }
 0x112   : > { %562 = vst.msk [vmem:[%s888_s18 + $0xc] sm:$0xf] %vm558_vm3, %v698_v6  ;;  %570 = vst.msk [vmem:[%s888_s18 + $0x2c] sm:$0xf] %vm558_vm3, %v706_v7  ;;  %v432_v10 = vadd.f32 %v878_v31, %v431_v8  ;;  %v464_v11 = vadd.f32 %v878_v31, %v463_v9  ;;  %v433_v12 = vpop.f32.mrb[9].mxu0  ;;  %v465_v13 = vpop.f32.mrb[9].mxu1 }
 0x113   : > { %v434_v14 = vpop.f32.mrb[10].mxu0  ;;  %v466_v15 = vpop.f32.mrb[10].mxu1 }
 0x114   : > { %v482_v16 = vmax.f32 %v432_v10, 0.0  ;;  %v490_v17 = vmax.f32 %v464_v11, 0.0  ;;  %v435_v18 = vadd.f32 %v878_v31, %v434_v14  ;;  %v467_v19 = vadd.f32 %v878_v31, %v466_v15  ;;  %v436_v20 = vpop.f32.mrb[11].mxu0  ;;  %v468_v21 = vpop.f32.mrb[11].mxu1 }
 0x116   : > { %v699_v22 = vpack.c.bf16 %v482_v16, %v482_v16  ;;  %v707_v23 = vpack.c.bf16 %v490_v17, %v490_v17  ;;  %v483_v24 = vmax.f32 %v435_v18, 0.0  ;;  %v491_v25 = vmax.f32 %v467_v19, 0.0 }
 0x118   : > { %563 = vst.msk [vmem:[%s888_s18 + $0x10] sm:$0xf] %vm558_vm3, %v699_v22  ;;  %571 = vst.msk [vmem:[%s888_s18 + $0x30] sm:$0xf] %vm558_vm3, %v707_v23  ;;  %v700_v26 = vpack.c.bf16 %v483_v24, %v483_v24  ;;  %v708_v27 = vpack.c.bf16 %v491_v25, %v491_v25 }
 0x119   : > { %v439_v28 = vpop.f32.mrb[12].mxu0  ;;  %v471_v29 = vpop.f32.mrb[12].mxu1 }
 0x11a   : > { %564 = vst.msk [vmem:[%s888_s18 + $0x14] sm:$0xf] %vm558_vm3, %v700_v26  ;;  %572 = vst.msk [vmem:[%s888_s18 + $0x34] sm:$0xf] %vm558_vm3, %v708_v27  ;;  %v440_v30 = vadd.f32 %v878_v31, %v439_v28  ;;  %v472_v32 = vadd.f32 %v878_v31, %v471_v29  ;;  %v441_v33 = vpop.f32.mrb[13].mxu0  ;;  %v473_v34 = vpop.f32.mrb[13].mxu1 }
 0x11b   : > { %v442_v35 = vpop.f32.mrb[14].mxu0  ;;  %v474_v36 = vpop.f32.mrb[14].mxu1 }
 0x11c   : > { %v484_v37 = vmax.f32 %v440_v30, 0.0  ;;  %v492_v38 = vmax.f32 %v472_v32, 0.0  ;;  %v443_v39 = vadd.f32 %v878_v31, %v442_v35  ;;  %v475_v40 = vadd.f32 %v878_v31, %v474_v36  ;;  %v444_v41 = vpop.f32.mrb[15].mxu0  ;;  %v476_v42 = vpop.f32.mrb[15].mxu1 }
 0x11e   : > { %v701_v43 = vpack.c.bf16 %v484_v37, %v484_v37  ;;  %v709_v44 = vpack.c.bf16 %v492_v38, %v492_v38  ;;  %v485_v45 = vmax.f32 %v443_v39, 0.0  ;;  %v493_v46 = vmax.f32 %v475_v40, 0.0 }
 0x120   : > { %565 = vst.msk [vmem:[%s888_s18 + $0x18] sm:$0xf] %vm558_vm3, %v701_v43  ;;  %573 = vst.msk [vmem:[%s888_s18 + $0x38] sm:$0xf] %vm558_vm3, %v709_v44  ;;  %v702_v47 = vpack.c.bf16 %v485_v45, %v485_v45  ;;  %v710_v48 = vpack.c.bf16 %v493_v46, %v493_v46 }
 0x122   : > { %566 = vst.msk [vmem:[%s888_s18 + $0x1c] sm:$0xf] %vm558_vm3, %v702_v47  ;;  %574 = vst.msk [vmem:[%s888_s18 + $0x3c] sm:$0xf] %vm558_vm3, %v710_v48 }
 0x123 PF: > { %s13_s12 = sadd.s32 1, %s781_s12  }
 0x124   : > { %p10_p4 = scmp.ge.s32.totalorder %s13_s12, 6  }
 0x126   :  { %12 = sbr.rel (!%p10_p4) target bundleno = 1 (0x1), region = 62 }

</bundles_post_ra>
